<compile_context>
chip_gen: v6e
topology: v6e:2x2x1
jax: 0.10.0
libtpu: 0.0.40
codegen_flags: <defaults>
</compile_context>

<pallas_src>
import functools
import math

import jax
import jax.numpy as jnp
from jax.experimental import pallas as pl
from jax.experimental.pallas import tpu as pltpu

BN_EPS = 1e-5

# Tiled (large-graph) path tile sizes.
_TM = 512     # node-row tile (multiple of 8)
_TK = 1024    # adjacency reduction tile (multiple of 128)


# --------------------------------------------------------------------------- #
# Hardware-aware sizing helpers
# --------------------------------------------------------------------------- #
def _round_up(n, m):
    return -(-n // m) * m


def _vmem_budget_bytes():
    """Per-generation VMEM budget (v5e/v6e: 128 MiB physical, v7x: 64 MiB)."""
    cap = 64 * 1024 * 1024              # conservative fallback (v7x)
    try:
        info = pltpu.get_tpu_info()
        cap = int(getattr(info, "vmem_capacity_bytes", cap) or cap)
    except Exception:
        pass
    # Leave ~25% headroom for compiler-internal scratch; 48 MiB on v7x,
    # up to 96 MiB on v5e/v6e.
    return min((cap * 3) // 4, 96 * 1024 * 1024)


def _whole_block_threshold(vmem_budget_bytes, h_dim):
    """Largest node count handled by the single fused whole-graph kernel.

    Budget model: bf16 adjacency (conservatively assume the pipeline keeps two
    copies -> 4*n^2 bytes) plus a handful of (n, max(H,128)) f32 intermediates,
    all under ~70% of the per-generation budget.  ~2.5k nodes on v7x (64 MiB),
    ~3.8k on v5e/v6e (128 MiB).
    """
    row_bytes = 24.0 * max(h_dim, 128)
    usable = 0.7 * vmem_budget_bytes
    n = (-row_bytes + math.sqrt(row_bytes * row_bytes + 16.0 * usable)) / 8.0
    return int(max(256, min(4096, (int(n) // 256) * 256)))


# --------------------------------------------------------------------------- #
# Kernels
# --------------------------------------------------------------------------- #
def _fused_kernel(adj_ref, x_ref, w1_ref, b1_ref, w2_ref, b2_ref,
                  gamma_ref, beta_ref, mean_ref, var_ref, wc_ref, bc_ref,
                  emb_ref, pred_ref):
    """Whole graph resident in VMEM: conv1 -> relu -> conv2 -> BN -> softmax."""
    adj = adj_ref[...]                                         # bf16
    # conv1: h1 = relu((A @ X) @ W1 + b1)  (A@X first: F_IN < HIDDEN)
    ax = jnp.dot(adj, x_ref[...], preferred_element_type=jnp.float32)
    h1 = jnp.dot(ax.astype(jnp.bfloat16), w1_ref[...],
                 preferred_element_type=jnp.float32) + b1_ref[...]
    h1 = jnp.maximum(h1, 0.0).astype(jnp.bfloat16)
    # dropout(p=0.3, training=False) is the identity.
    # conv_last: h2 = (A @ H1) @ W2 + b2
    ah1 = jnp.dot(adj, h1, preferred_element_type=jnp.float32)
    h2 = jnp.dot(ah1.astype(jnp.bfloat16), w2_ref[...],
                 preferred_element_type=jnp.float32) + b2_ref[...]
    # BatchNorm1d, eval mode (running stats), f32 elementwise.
    inv_std = jax.lax.rsqrt(var_ref[...] + BN_EPS)
    emb = (h2 - mean_ref[...]) * inv_std * gamma_ref[...] + beta_ref[...]
    emb_ref[...] = emb
    # classifier + softmax(dim=1)
    logits = jnp.dot(emb.astype(jnp.bfloat16), wc_ref[...],
                     preferred_element_type=jnp.float32) + bc_ref[...]
    m = jnp.max(logits, axis=1, keepdims=True)
    e = jnp.exp(logits - m)
    pred_ref[...] = e * pl.reciprocal(jnp.sum(e, axis=1, keepdims=True),
                                      approx=True)


def _conv1_kernel(adj_ref, x_ref, w1_ref, b1_ref, h1_ref, acc_ref, *, tk):
    """h1 = relu((A @ X) @ W1 + b1), accumulated over the adjacency K axis.

    x is fully VMEM-resident (read from HBM once); only the adjacency streams.
    """
    k = pl.program_id(1)

    @pl.when(k == 0)
    def _init():
        acc_ref[...] = jnp.zeros_like(acc_ref)

    start = pl.multiple_of(k * tk, tk)
    acc_ref[...] += jnp.dot(adj_ref[...], x_ref[pl.ds(start, tk), :],
                            preferred_element_type=jnp.float32)

    @pl.when(k == pl.num_programs(1) - 1)
    def _finalize():
        h = jnp.dot(acc_ref[...].astype(jnp.bfloat16), w1_ref[...],
                    preferred_element_type=jnp.float32) + b1_ref[...]
        h1_ref[...] = jnp.maximum(h, 0.0).astype(h1_ref.dtype)


def _conv2_head_kernel(adj_ref, h1_ref, w2_ref, b2_ref,
                       gamma_ref, beta_ref, mean_ref, var_ref,
                       wc_ref, bc_ref,
                       emb_ref, pred_ref, acc_ref, *, tk):
    """h2 = (A @ H1) @ W2 + b2 ; emb = BN(h2) ; pred = softmax(emb @ Wc + bc).

    h1 is fully VMEM-resident (read from HBM once); only the adjacency streams.
    """
    k = pl.program_id(1)

    @pl.when(k == 0)
    def _init():
        acc_ref[...] = jnp.zeros_like(acc_ref)

    start = pl.multiple_of(k * tk, tk)
    acc_ref[...] += jnp.dot(adj_ref[...], h1_ref[pl.ds(start, tk), :],
                            preferred_element_type=jnp.float32)

    @pl.when(k == pl.num_programs(1) - 1)
    def _finalize():
        h2 = jnp.dot(acc_ref[...].astype(jnp.bfloat16), w2_ref[...],
                     preferred_element_type=jnp.float32) + b2_ref[...]
        inv_std = jax.lax.rsqrt(var_ref[...] + BN_EPS)
        emb = (h2 - mean_ref[...]) * inv_std * gamma_ref[...] + beta_ref[...]
        emb_ref[...] = emb
        logits = jnp.dot(emb.astype(jnp.bfloat16), wc_ref[...],
                         preferred_element_type=jnp.float32) + bc_ref[...]
        m = jnp.max(logits, axis=1, keepdims=True)
        e = jnp.exp(logits - m)
        pred_ref[...] = e * pl.reciprocal(jnp.sum(e, axis=1, keepdims=True),
                                          approx=True)


# --------------------------------------------------------------------------- #
# Wrapper-side glue
# --------------------------------------------------------------------------- #
def _normalized_adjacency(edge_index, num_nodes):
    """Dense symmetric-normalized adjacency with self loops (GCN style).

    Scatter build (no O(E*N) one-hot matmuls). Duplicate edges collapse to 1
    and self loops get unit weight before normalization.
    """
    src, dst = edge_index[0], edge_index[1]
    adj = jnp.zeros((num_nodes, num_nodes), jnp.float32)
    adj = adj.at[dst, src].max(1.0)                          # messages src -> dst
    adj = jnp.maximum(adj, jnp.eye(num_nodes, dtype=jnp.float32))
    deg = jnp.sum(adj, axis=1)
    d_inv_sqrt = jnp.where(deg > 0, jax.lax.rsqrt(deg), 0.0)
    return d_inv_sqrt[:, None] * adj * d_inv_sqrt[None, :]


@functools.partial(jax.jit, static_argnames=("num_nodes", "force_tiled"))
def gnn_forward(x, edge_attr, edge_index, params, *, num_nodes,
                force_tiled=False):
    # TODO(synk): edge_attr gating/attention (CGConv/TransformerConv) not modeled.
    del edge_attr

    f_in = x.shape[1]
    H = params["w2"].shape[1]
    C = params["wc"].shape[1]

    vmem_limit = _vmem_budget_bytes()
    whole_n = _whole_block_threshold(vmem_limit, H)

    adj = _normalized_adjacency(edge_index, num_nodes)

    # bf16 operands for the MXU; f32 accumulation and elementwise math in-kernel.
    w1 = params["w1"].astype(jnp.bfloat16)
    w2 = params["w2"].astype(jnp.bfloat16)
    wc = params["wc"].astype(jnp.bfloat16)
    b1, b2, bc = params["b1"], params["b2"], params["bc"]
    gamma, beta = params["bn_gamma"], params["bn_beta"]
    mean, var = params["bn_mean"], params["bn_var"]

    use_fused = (num_nodes <= whole_n) and (not force_tiled)
    n_pad = _round_up(num_nodes, 128 if use_fused else max(_TM, _TK))

    if n_pad != num_nodes:
        pad = n_pad - num_nodes
        adj = jnp.pad(adj, ((0, pad), (0, pad)))
        x = jnp.pad(x, ((0, pad), (0, 0)))

    adj_bf16 = adj.astype(jnp.bfloat16)
    x_bf16 = x.astype(jnp.bfloat16)

    if use_fused:
        # Single fused kernel: one adjacency HBM read, h1 never leaves VMEM.
        emb, pred = pl.pallas_call(
            _fused_kernel,
            out_shape=(jax.ShapeDtypeStruct((n_pad, H), jnp.float32),
                       jax.ShapeDtypeStruct((n_pad, C), jnp.float32)),
            compiler_params=pltpu.CompilerParams(vmem_limit_bytes=vmem_limit),
            cost_estimate=pl.CostEstimate(
                flops=2 * n_pad * n_pad * (f_in + H)
                + 2 * n_pad * (f_in * H + H * H + H * C),
                transcendentals=n_pad * (C + 2),
                bytes_accessed=2 * n_pad * n_pad + 2 * n_pad * f_in
                + 4 * n_pad * (H + C)),
        )(adj_bf16, x_bf16, w1, b1, w2, b2, gamma, beta, mean, var, wc, bc)
    else:
        tm, tk = _TM, _TK
        grid = (n_pad // tm, n_pad // tk)
        cparams = pltpu.CompilerParams(
            dimension_semantics=("parallel", "arbitrary"),
            vmem_limit_bytes=vmem_limit)
        full = lambda i, k: (0, 0)

        # ---- conv1: h1 = relu((A @ X) @ W1 + b1) ----------------------------
        h1 = pl.pallas_call(
            functools.partial(_conv1_kernel, tk=tk),
            out_shape=jax.ShapeDtypeStruct((n_pad, H), jnp.bfloat16),
            grid=grid,
            in_specs=[
                pl.BlockSpec((tm, tk), lambda i, k: (i, k)),    # adj (streamed)
                pl.BlockSpec((n_pad, f_in), full),              # x (resident)
                pl.BlockSpec((f_in, H), full),                  # w1
                pl.BlockSpec((1, H), full),                     # b1
            ],
            out_specs=pl.BlockSpec((tm, H), lambda i, k: (i, 0)),
            scratch_shapes=[pltpu.VMEM((tm, f_in), jnp.float32)],
            compiler_params=cparams,
            cost_estimate=pl.CostEstimate(
                flops=2 * n_pad * n_pad * f_in + 2 * n_pad * f_in * H,
                transcendentals=0,
                bytes_accessed=2 * n_pad * n_pad + 2 * n_pad * f_in
                + 2 * n_pad * H),
        )(adj_bf16, x_bf16, w1, b1)

        # ---- conv2 + BN + classifier + softmax ------------------------------
        emb, pred = pl.pallas_call(
            functools.partial(_conv2_head_kernel, tk=tk),
            out_shape=(jax.ShapeDtypeStruct((n_pad, H), jnp.float32),
                       jax.ShapeDtypeStruct((n_pad, C), jnp.float32)),
            grid=grid,
            in_specs=[
                pl.BlockSpec((tm, tk), lambda i, k: (i, k)),    # adj (streamed)
                pl.BlockSpec((n_pad, H), full),                 # h1 (resident)
                pl.BlockSpec((H, H), full),                     # w2
                pl.BlockSpec((1, H), full),                     # b2
                pl.BlockSpec((1, H), full),                     # gamma
                pl.BlockSpec((1, H), full),                     # beta
                pl.BlockSpec((1, H), full),                     # running mean
                pl.BlockSpec((1, H), full),                     # running var
                pl.BlockSpec((H, C), full),                     # wc
                pl.BlockSpec((1, C), full),                     # bc
            ],
            out_specs=(pl.BlockSpec((tm, H), lambda i, k: (i, 0)),
                       pl.BlockSpec((tm, C), lambda i, k: (i, 0))),
            scratch_shapes=[pltpu.VMEM((tm, H), jnp.float32)],
            compiler_params=cparams,
            cost_estimate=pl.CostEstimate(
                flops=2 * n_pad * n_pad * H + 2 * n_pad * H * H
                + 2 * n_pad * H * C,
                transcendentals=n_pad * (C + 2),
                bytes_accessed=2 * n_pad * n_pad + 2 * n_pad * H
                + 4 * n_pad * (H + C)),
        )(adj_bf16, h1, w2, b2, gamma, beta, mean, var, wc, bc)

    emb = emb[:num_nodes]
    pred = pred[:num_nodes]
    # argmax over pred == argmax over logits (softmax is monotone); done in the
    # wrapper to keep kernel outputs lane-dense.
    pred_argmax = jnp.argmax(pred, axis=1).astype(jnp.int32)
    return pred_argmax, emb, pred


def init_params(key, f_in, hidden, n_classes):
    ks = jax.random.split(key, 3)
    scale1 = 1.0 / jnp.sqrt(f_in)
    scale2 = 1.0 / jnp.sqrt(hidden)
    return {
        "w1": jax.random.normal(ks[0], (f_in, hidden), jnp.float32) * scale1,
        "b1": jnp.zeros((1, hidden), jnp.float32),
        "w2": jax.random.normal(ks[1], (hidden, hidden), jnp.float32) * scale2,
        "b2": jnp.zeros((1, hidden), jnp.float32),
        # BatchNorm1d eval-mode parameters / running stats
        "bn_gamma": jnp.ones((1, hidden), jnp.float32),
        "bn_beta": jnp.zeros((1, hidden), jnp.float32),
        "bn_mean": jnp.zeros((1, hidden), jnp.float32),
        "bn_var": jnp.ones((1, hidden), jnp.float32),
        # classifier Linear
        "wc": jax.random.normal(ks[2], (hidden, n_classes), jnp.float32) * scale2,
        "bc": jnp.zeros((1, n_classes), jnp.float32),
    }


if __name__ == "__main__":
    N_NODES = 16      # number of graph nodes
    F_IN = 8          # node feature dim
    HIDDEN = 32       # conv hidden dim / embedding dim
    N_CLASSES = 4     # classifier output dim
    N_EDGES = 32
    EDGE_DIM = 4

    key = jax.random.PRNGKey(0)
    k_x, k_ea, k_ei, k_p = jax.random.split(key, 4)

    x = jax.random.normal(k_x, (N_NODES, F_IN), jnp.float32)
    edge_attr = jax.random.normal(k_ea, (N_EDGES, EDGE_DIM), jnp.float32)
    edge_index = jax.random.randint(k_ei, (2, N_EDGES), 0, N_NODES,
                                    dtype=jnp.int32)
    params = init_params(k_p, F_IN, HIDDEN, N_CLASSES)

    # ---- fused whole-graph path (small graph) --------------------------------
    pred_argmax, embeddings, prediction = gnn_forward(
        x, edge_attr, edge_index, params, num_nodes=N_NODES)
    jax.block_until_ready((pred_argmax, embeddings, prediction))

    assert pred_argmax.shape == (N_NODES,)
    assert embeddings.shape == (N_NODES, HIDDEN)
    assert prediction.shape == (N_NODES, N_CLASSES)
    # softmax rows sum to 1 (approx reciprocal -> ~1e-3 tolerance)
    assert jnp.allclose(jnp.sum(prediction, axis=1), 1.0, atol=5e-3)

    # ---- tiled large-graph path: same semantics with streamed adjacency ------
    N_BIG, E_BIG = 1050, 4096
    kb_x, kb_ei = jax.random.split(jax.random.PRNGKey(1), 2)
    x_big = jax.random.normal(kb_x, (N_BIG, F_IN), jnp.float32)
    ei_big = jax.random.randint(kb_ei, (2, E_BIG), 0, N_BIG, dtype=jnp.int32)
    ea_big = jnp.zeros((E_BIG, EDGE_DIM), jnp.float32)

    pa_f, emb_f, pred_f = gnn_forward(
        x_big, ea_big, ei_big, params, num_nodes=N_BIG)
    pa_t, emb_t, pred_t = gnn_forward(
        x_big, ea_big, ei_big, params, num_nodes=N_BIG, force_tiled=True)
    jax.block_until_ready((pa_f, emb_f, pred_f, pa_t, emb_t, pred_t))

    assert emb_t.shape == (N_BIG, HIDDEN)
    assert pred_t.shape == (N_BIG, N_CLASSES)
    assert jnp.allclose(jnp.sum(pred_t, axis=1), 1.0, atol=5e-3)
    # fused and tiled paths agree (bf16 operands -> loose tolerance)
    assert float(jnp.max(jnp.abs(emb_t - emb_f))) < 1e-1
    assert float(jnp.max(jnp.abs(pred_t - pred_f))) < 5e-2

    print("KERNEL_OK")
</pallas_src>

<mosaic_0001>
module attributes {stable_mosaic.version = 11 : i64} {
  func.func private @main(%arg0: i32) attributes {dimension_semantics = [#tpu.dimension_semantics<core_parallel>], iteration_bounds = array<i64: 2>, tpu.core_type = #tpu.core_type<sc_scalar_subcore>, window_params = []} {
    return
  }
}

module attributes {stable_mosaic.version = 11 : i64} {
  func.func private @main(%arg0: i32) attributes {dimension_semantics = [#tpu.dimension_semantics<core_parallel>], iteration_bounds = array<i64: 2>, tpu.core_type = #tpu.core_type<sc_scalar_subcore>, window_params = []} {
    return
  }
}

module attributes {stable_mosaic.version = 11 : i64} {
  func.func @_fused_kernel(%arg0: memref<128x128xbf16, #tpu.memory_space<vmem>>, %arg1: memref<128x8xbf16, #tpu.memory_space<vmem>>, %arg2: memref<8x32xbf16, #tpu.memory_space<vmem>>, %arg3: memref<1x32xf32, #tpu.memory_space<vmem>>, %arg4: memref<32x32xbf16, #tpu.memory_space<vmem>>, %arg5: memref<1x32xf32, #tpu.memory_space<vmem>>, %arg6: memref<1x32xf32, #tpu.memory_space<vmem>>, %arg7: memref<1x32xf32, #tpu.memory_space<vmem>>, %arg8: memref<1x32xf32, #tpu.memory_space<vmem>>, %arg9: memref<1x32xf32, #tpu.memory_space<vmem>>, %arg10: memref<32x4xbf16, #tpu.memory_space<vmem>>, %arg11: memref<1x4xf32, #tpu.memory_space<vmem>>, %arg12: memref<128x32xf32, #tpu.memory_space<vmem>>, %arg13: memref<128x4xf32, #tpu.memory_space<vmem>>) attributes {dimension_semantics = [], scalar_prefetch = 0 : i64, scratch_operands = 0 : i64, tpu.core_type = #tpu.core_type<tc>} {
    %c0 = arith.constant 0 : index
    %c0_0 = arith.constant 0 : index
    %0 = vector.load %arg0[%c0, %c0_0] : memref<128x128xbf16, #tpu.memory_space<vmem>>, vector<128x128xbf16>
    %c0_1 = arith.constant 0 : index
    %c0_2 = arith.constant 0 : index
    %1 = vector.load %arg1[%c0_1, %c0_2] : memref<128x8xbf16, #tpu.memory_space<vmem>>, vector<128x8xbf16>
    %cst = arith.constant dense<0.000000e+00> : vector<128x8xf32>
    %2 = tpu.matmul %0, %1, %cst {dimension_numbers = #tpu.dot_dimension_numbers<[1], [0], [0], [1], [0, 0, 1, 1], [], []>} : vector<128x128xbf16>, vector<128x8xbf16>, vector<128x8xf32> -> vector<128x8xf32>
    %3 = arith.truncf %2 : vector<128x8xf32> to vector<128x8xbf16>
    %c0_3 = arith.constant 0 : index
    %c0_4 = arith.constant 0 : index
    %4 = vector.load %arg2[%c0_3, %c0_4] : memref<8x32xbf16, #tpu.memory_space<vmem>>, vector<8x32xbf16>
    %cst_5 = arith.constant dense<0.000000e+00> : vector<128x32xf32>
    %5 = tpu.matmul %3, %4, %cst_5 {dimension_numbers = #tpu.dot_dimension_numbers<[1], [0], [0], [1], [0, 0, 1, 1], [], []>} : vector<128x8xbf16>, vector<8x32xbf16>, vector<128x32xf32> -> vector<128x32xf32>
    %c0_6 = arith.constant 0 : index
    %c0_7 = arith.constant 0 : index
    %6 = vector.load %arg3[%c0_6, %c0_7] : memref<1x32xf32, #tpu.memory_space<vmem>>, vector<1x32xf32>
    %7 = vector.broadcast %6 : vector<1x32xf32> to vector<128x32xf32>
    %8 = arith.addf %5, %7 : vector<128x32xf32>
    %cst_8 = arith.constant 0.000000e+00 : f32
    %9 = vector.broadcast %cst_8 : f32 to vector<128x32xf32>
    %10 = arith.maximumf %8, %9 : vector<128x32xf32>
    %11 = arith.truncf %10 : vector<128x32xf32> to vector<128x32xbf16>
    %cst_9 = arith.constant dense<0.000000e+00> : vector<128x32xf32>
    %12 = tpu.matmul %0, %11, %cst_9 {dimension_numbers = #tpu.dot_dimension_numbers<[1], [0], [0], [1], [0, 0, 1, 1], [], []>} : vector<128x128xbf16>, vector<128x32xbf16>, vector<128x32xf32> -> vector<128x32xf32>
    %13 = arith.truncf %12 : vector<128x32xf32> to vector<128x32xbf16>
    %c0_10 = arith.constant 0 : index
    %c0_11 = arith.constant 0 : index
    %14 = vector.load %arg4[%c0_10, %c0_11] : memref<32x32xbf16, #tpu.memory_space<vmem>>, vector<32x32xbf16>
    %cst_12 = arith.constant dense<0.000000e+00> : vector<128x32xf32>
    %15 = tpu.matmul %13, %14, %cst_12 {dimension_numbers = #tpu.dot_dimension_numbers<[1], [0], [0], [1], [0, 0, 1, 1], [], []>} : vector<128x32xbf16>, vector<32x32xbf16>, vector<128x32xf32> -> vector<128x32xf32>
    %c0_13 = arith.constant 0 : index
    %c0_14 = arith.constant 0 : index
    %16 = vector.load %arg5[%c0_13, %c0_14] : memref<1x32xf32, #tpu.memory_space<vmem>>, vector<1x32xf32>
    %17 = vector.broadcast %16 : vector<1x32xf32> to vector<128x32xf32>
    %18 = arith.addf %15, %17 : vector<128x32xf32>
    %c0_15 = arith.constant 0 : index
    %c0_16 = arith.constant 0 : index
    %19 = vector.load %arg9[%c0_15, %c0_16] : memref<1x32xf32, #tpu.memory_space<vmem>>, vector<1x32xf32>
    %cst_17 = arith.constant 9.99999974E-6 : f32
    %20 = vector.broadcast %cst_17 : f32 to vector<1x32xf32>
    %21 = arith.addf %19, %20 : vector<1x32xf32>
    %22 = math.rsqrt %21 : vector<1x32xf32>
    %c0_18 = arith.constant 0 : index
    %c0_19 = arith.constant 0 : index
    %23 = vector.load %arg8[%c0_18, %c0_19] : memref<1x32xf32, #tpu.memory_space<vmem>>, vector<1x32xf32>
    %24 = vector.broadcast %23 : vector<1x32xf32> to vector<128x32xf32>
    %25 = arith.subf %18, %24 : vector<128x32xf32>
    %26 = vector.broadcast %22 : vector<1x32xf32> to vector<128x32xf32>
    %27 = arith.mulf %25, %26 : vector<128x32xf32>
    %c0_20 = arith.constant 0 : index
    %c0_21 = arith.constant 0 : index
    %28 = vector.load %arg6[%c0_20, %c0_21] : memref<1x32xf32, #tpu.memory_space<vmem>>, vector<1x32xf32>
    %29 = vector.broadcast %28 : vector<1x32xf32> to vector<128x32xf32>
    %30 = arith.mulf %27, %29 : vector<128x32xf32>
    %c0_22 = arith.constant 0 : index
    %c0_23 = arith.constant 0 : index
    %31 = vector.load %arg7[%c0_22, %c0_23] : memref<1x32xf32, #tpu.memory_space<vmem>>, vector<1x32xf32>
    %32 = vector.broadcast %31 : vector<1x32xf32> to vector<128x32xf32>
    %33 = arith.addf %30, %32 : vector<128x32xf32>
    %c0_24 = arith.constant 0 : index
    %c0_25 = arith.constant 0 : index
    %34 = vector.load %arg12[%c0_24, %c0_25] : memref<128x32xf32, #tpu.memory_space<vmem>>, vector<128x32xf32>
    tpu.vector_store %arg12[%c0_24, %c0_25], %33 {strides = array<i32>} : memref<128x32xf32, #tpu.memory_space<vmem>>, vector<128x32xf32>,
    %35 = arith.truncf %33 : vector<128x32xf32> to vector<128x32xbf16>
    %c0_26 = arith.constant 0 : index
    %c0_27 = arith.constant 0 : index
    %36 = vector.load %arg10[%c0_26, %c0_27] : memref<32x4xbf16, #tpu.memory_space<vmem>>, vector<32x4xbf16>
    %cst_28 = arith.constant dense<0.000000e+00> : vector<128x4xf32>
    %37 = tpu.matmul %35, %36, %cst_28 {dimension_numbers = #tpu.dot_dimension_numbers<[1], [0], [0], [1], [0, 0, 1, 1], [], []>} : vector<128x32xbf16>, vector<32x4xbf16>, vector<128x4xf32> -> vector<128x4xf32>
    %c0_29 = arith.constant 0 : index
    %c0_30 = arith.constant 0 : index
    %38 = vector.load %arg11[%c0_29, %c0_30] : memref<1x4xf32, #tpu.memory_space<vmem>>, vector<1x4xf32>
    %39 = vector.broadcast %38 : vector<1x4xf32> to vector<128x4xf32>
    %40 = arith.addf %37, %39 : vector<128x4xf32>
    %cst_31 = arith.constant dense<0xFF800000> : vector<128xf32>
    %41 = vector.multi_reduction <maximumf>, %40, %cst_31 [1] : vector<128x4xf32> to vector<128xf32>
    %42 = vector.shape_cast %41 : vector<128xf32> to vector<128x1xf32>
    %43 = vector.broadcast %42 : vector<128x1xf32> to vector<128x4xf32>
    %44 = arith.subf %40, %43 : vector<128x4xf32>
    %45 = math.exp %44 : vector<128x4xf32>
    %cst_32 = arith.constant dense<0.000000e+00> : vector<128xf32>
    %46 = vector.multi_reduction <add>, %45, %cst_32 [1] : vector<128x4xf32> to vector<128xf32>
    %47 = vector.shape_cast %46 : vector<128xf32> to vector<128x1xf32>
    %48 = tpu.reciprocal %47 {approx = true} : vector<128x1xf32> -> vector<128x1xf32>
    %49 = vector.broadcast %48 : vector<128x1xf32> to vector<128x4xf32>
    %50 = arith.mulf %45, %49 : vector<128x4xf32>
    %c0_33 = arith.constant 0 : index
    %c0_34 = arith.constant 0 : index
    %51 = vector.load %arg13[%c0_33, %c0_34] : memref<128x4xf32, #tpu.memory_space<vmem>>, vector<128x4xf32>
    tpu.vector_store %arg13[%c0_33, %c0_34], %50 {strides = array<i32>} : memref<128x4xf32, #tpu.memory_space<vmem>>, vector<128x4xf32>,
    return
  }
}

</mosaic_0001>

<bundles_post_ra>
// kernel: gnn_forward.1
= control target key start
LH: loop header
LB: loop body
LE: loop exit
PB: predicated region body
PF: predicated region fallthrough
CT: control target
= control target key end

     0   :  { %vm310_vm0 = vcmask 1043456   ;;  %vm285_vm1 = vcmask 64512   ;;  %vm563_vm2 = vcmask 261120   ;;  %vm947_vm3 = vcmask 31744   ;;  %s2056_s1 = inlined_call_operand.vmem [shape: bf16[128,8], index: 1, kind: input, shape index: {}]   ;;  %s2057_s0 = inlined_call_operand.vmem [shape: bf16[128,128], index: 0, kind: input, shape index: {}]   ;;  %s2058_s2 = inlined_call_operand.vmem [shape: bf16[8,32], index: 2, kind: input, shape index: {}]   ;;  %s2059_s4 = inlined_call_operand.vmem [shape: bf16[32,32], index: 4, kind: input, shape index: {}]   ;;  %s2060_s3 = inlined_call_operand.vmem [shape: f32[1,32], index: 3, kind: input, shape index: {}]   ;;  %s2061_s10 = inlined_call_operand.vmem [shape: bf16[32,4], index: 10, kind: input, shape index: {}]   ;;  %s2062_s9 = inlined_call_operand.vmem [shape: f32[1,32], index: 9, kind: input, shape index: {}]   ;;  %s2063_s5 = inlined_call_operand.vmem [shape: f32[1,32], index: 5, kind: input, shape index: {}]   ;;  %s2064_s8 = inlined_call_operand.vmem [shape: f32[1,32], index: 8, kind: input, shape index: {}]   ;;  %s2065_s6 = inlined_call_operand.vmem [shape: f32[1,32], index: 6, kind: input, shape index: {}]   ;;  %s2066_s7 = inlined_call_operand.vmem [shape: f32[1,32], index: 7, kind: input, shape index: {}]   ;;  %s2067_s12 = inlined_call_operand.vmem [shape: f32[128,32], index: 12, kind: output, shape index: {0}]   ;;  %s2068_s11 = inlined_call_operand.vmem [shape: f32[1,4], index: 11, kind: input, shape index: {}]   ;;  %s2069_s13 = inlined_call_operand.vmem [shape: f32[128,4], index: 13, kind: output, shape index: {1}]  }
   0x1   :  { %v1382_v0 = vld [vmem:[%s2056_s1 + $0x38] sm:$0xff]   ;;  %v1383_v1 = vld [vmem:[%s2056_s1 + $0x30] sm:$0xff]   ;;  %v1384_v2 = vld [vmem:[%s2056_s1 + $0x28] sm:$0xff]  }
   0x2   :  { %1259 = vmatprep.subr.bf16.mxu0 %v1382_v0  ;;  %v1385_v3 = vld [vmem:[%s2056_s1 + $0x20] sm:$0xff]   ;;  %v1386_v5 = vld [vmem:[%s2056_s1 + $0x18] sm:$0xff]   ;;  %v1387_v6 = vld [vmem:[%s2056_s1 + $0x10] sm:$0xff]  }
   0x3   :  { %1260 = vmatpush3.bf16.msra.mxu0 %v1382_v0  ;;  %v1553_v4 = vld [vmem:[%s2057_s0] sm:$0xff]   ;;  %v1388_v7 = vld [vmem:[%s2056_s1 + $0x8] sm:$0xff]   ;;  %v1576_v10 = vld [vmem:[%s2057_s0 + $0x10] sm:$0xff]  }
   0x4   :  { %1261 = vmatprep.subr.bf16.mxu0 %v1383_v1  ;;  %1275 = vmatprep.mubr.bf16.mxu0 %v1553_v4  ;;  %v1389_v8 = vld [vmem:[%s2056_s1] sm:$0xff]   ;;  %v1571_v9 = vld [vmem:[%s2057_s0 + $0x8] sm:$0xff]   ;;  %v1583_v11 = vld [vmem:[%s2057_s0 + $0x18] sm:$0xff]  }
   0x5   :  { %v1588_v12 = vld [vmem:[%s2057_s0 + $0x20] sm:$0xff]   ;;  %v1595_v13 = vld [vmem:[%s2057_s0 + $0x28] sm:$0xff]   ;;  %v1600_v14 = vld [vmem:[%s2057_s0 + $0x30] sm:$0xff]  }
   0x6   :  { %v1607_v15 = vld [vmem:[%s2057_s0 + $0x38] sm:$0xff]   ;;  %v277_v16 = vld [vmem:[%s2058_s2] sm:$0xf]  ;;  %v1398_v42 = vld [vmem:[%s2059_s4 + $0x8] sm:$0xff]  }
   0x7   :  { %1262 = vmatpush3.bf16.msra.mxu0 %v1383_v1  ;;  %1381 = vmatprep.subr.msk.bf16.mxu1 %vm310_vm0, %v277_v16  ;;  %v312_v17 = vsel %vm310_vm0, %v277_v16, 0  ;;  %v1399_v43 = vld [vmem:[%s2059_s4] sm:$0xff]  }
   0x8   :  { %1263 = vmatprep.subr.bf16.mxu0 %v1384_v2  ;;  %1292 = vmatpush3.bf16.msra.mxu1 %v312_v17  ;;  %v1164_v57 = vld [vmem:[%s2060_s3] ss:$0 sm:$0xff] }
   0xb   :  { %1264 = vmatpush3.bf16.msra.mxu0 %v1384_v2 }
   0xc   :  { %1265 = vmatprep.subr.bf16.mxu0 %v1385_v3 }
   0xf   :  { %1266 = vmatpush3.bf16.msra.mxu0 %v1385_v3 }
  0x10   :  { %1267 = vmatprep.subr.bf16.mxu0 %v1386_v5 }
  0x13   :  { %1268 = vmatpush3.bf16.msra.mxu0 %v1386_v5 }
  0x14   :  { %1269 = vmatprep.subr.bf16.mxu0 %v1387_v6 }
  0x17   :  { %1270 = vmatpush3.bf16.msra.mxu0 %v1387_v6 }
  0x18   :  { %1271 = vmatprep.subr.bf16.mxu0 %v1388_v7 }
  0x1b   :  { %1272 = vmatpush3.bf16.msra.mxu0 %v1388_v7 }
  0x1c   :  { %1273 = vmatprep.subr.bf16.mxu0 %v1389_v8 }
  0x1f   :  { %1274 = vmatpush3.bf16.msra.mxu0 %v1389_v8 }
  0x20   :  { %1341 = vmatprep.subr.bf16.mxu0 %v1398_v42 }
  0x22   :  { %1276 = vmatmul.mubr.bf16.vlgmr.msra.gmra.mxu0 %v1571_v9 }
  0x23   :  { %1279 = vmatprep.mubr.bf16.mxu0 %v1576_v10  ;;  %1342 = vmatpush3.bf16.msra.mxu0 %v1398_v42 }
  0x24   :  { %1343 = vmatprep.subr.bf16.mxu0 %v1399_v43 }
  0x27   :  { %1344 = vmatpush3.bf16.msra.mxu0 %v1399_v43 }
  0x2a   :  { %1280 = vmatmul.mubr.bf16.gmra.mxu0 %v1583_v11 }
  0x2b   :  { %1283 = vmatprep.mubr.bf16.mxu0 %v1588_v12 }
  0x32   :  { %1284 = vmatmul.mubr.bf16.gmra.mxu0 %v1595_v13 }
  0x33   :  { %1287 = vmatprep.mubr.bf16.mxu0 %v1600_v14 }
  0x3a   :  { %1288 = vmatmul.mubr.bf16.gmra.mxu0 %v1607_v15 }
  0xe2   :  { %v1277_v18 = vpop.f32.mrf.mxu0 }
  0xe4   :  { %v206_v19 = vpop.f32.mrf.mxu0 }
  0xe6   :  { %v1278_v20 = vpop.f32.mrf.mxu0 }
  0xe7   :  { %v270_v23 = vpack.c.bf16 %v1278_v20, %v1277_v18 }
  0xe8   :  { %v209_v21 = vpop.f32.mrf.mxu0 }
  0xe9   :  { %v269_v22 = vpack.c.bf16 %v209_v21, %v206_v19 }
  0xea   :  { %v1281_v24 = vpop.f32.mrf.mxu0 }
  0xeb   :  { %1293 = vmatprep.mubr.msk.bf16.mxu1 %vm285_vm1, %v269_v22 }
  0xec   :  { %v222_v25 = vpop.f32.mrf.mxu0  ;;  %1294 = vmatmul.mubr.msk.bf16.vlgmr.msra.gmra.mxu1 %vm285_vm1, %v270_v23 }
  0xee   :  { %v1282_v26 = vpop.f32.mrf.mxu0 }
  0xef   :  { %v272_v29 = vpack.c.bf16 %v1282_v26, %v1281_v24 }
  0xf0   :  { %v225_v27 = vpop.f32.mrf.mxu0 }
  0xf1   :  { %v271_v28 = vpack.c.bf16 %v225_v27, %v222_v25 }
  0xf2   :  { %v1285_v30 = vpop.f32.mrf.mxu0 }
  0xf3   :  { %1297 = vmatprep.mubr.msk.bf16.mxu1 %vm285_vm1, %v271_v28 }
  0xf4   :  { %v238_v31 = vpop.f32.mrf.mxu0  ;;  %1298 = vmatmul.mubr.msk.bf16.gmra.mxu1 %vm285_vm1, %v272_v29 }
  0xf6   :  { %v1286_v32 = vpop.f32.mrf.mxu0 }
  0xf7   :  { %v274_v35 = vpack.c.bf16 %v1286_v32, %v1285_v30 }
  0xf8   :  { %v241_v33 = vpop.f32.mrf.mxu0 }
  0xf9   :  { %v273_v34 = vpack.c.bf16 %v241_v33, %v238_v31 }
  0xfa   :  { %v1289_v36 = vpop.f32.mrf.mxu0 }
  0xfb   :  { %1301 = vmatprep.mubr.msk.bf16.mxu1 %vm285_vm1, %v273_v34 }
  0xfc   :  { %v254_v37 = vpop.f32.mrf.mxu0  ;;  %1302 = vmatmul.mubr.msk.bf16.gmra.mxu1 %vm285_vm1, %v274_v35 }
  0xfe   :  { %v1290_v38 = vpop.f32.mrf.mxu0 }
  0xff   :  { %v276_v41 = vpack.c.bf16 %v1290_v38, %v1289_v36 }
 0x100   :  { %v257_v39 = vpop.f32.mrf.mxu0 }
 0x101   :  { %v275_v40 = vpack.c.bf16 %v257_v39, %v254_v37 }
 0x103   :  { %1305 = vmatprep.mubr.msk.bf16.mxu1 %vm285_vm1, %v275_v40 }
 0x104   :  { %1306 = vmatmul.mubr.msk.bf16.gmra.mxu1 %vm285_vm1, %v276_v41 }
 0x105   :  { %1325 = vmatprep.mubr.bf16.mxu1 %v1553_v4 }
 0x1ac   :  { %v1295_v44 = vpop.f32.mrf.mxu1 }
 0x1ad   :  { %v357_v33 = vadd.f32 %v1295_v44, %v1164_v57  ;;  %v1400_v44 = vld [vmem:[%s2061_s10 + $0x8] sm:$0xff]  }
 0x1ae   :  { %v348_v45 = vpop.f32.mrf.mxu1 }
 0x1af   :  { %v413_v38 = vmax.f32 %v357_v33, 0.0  ;;  %v349_v39 = vadd.f32 %v1164_v57, %v348_v45 }
 0x1b0   :  { %v1296_v46 = vpop.f32.mrf.mxu1 }
 0x1b1   :  { %v360_v30 = vadd.f32 %v1296_v46, %v1164_v57  ;;  %v411_v42 = vmax.f32 %v349_v39, 0.0 }
 0x1b2   :  { %v351_v47 = vpop.f32.mrf.mxu1 }
 0x1b3   :  { %v414_v35 = vmax.f32 %v360_v30, 0.0  ;;  %v352_v36 = vadd.f32 %v1164_v57, %v351_v47 }
 0x1b4   :  { %v1299_v48 = vpop.f32.mrf.mxu1 }
 0x1b5   :  { %v373_v23 = vadd.f32 %v1299_v48, %v1164_v57  ;;  %v428_v40 = vpack.c.bf16 %v414_v35, %v413_v38  ;;  %v412_v41 = vmax.f32 %v352_v36, 0.0 }
 0x1b6   :  { %v364_v49 = vpop.f32.mrf.mxu1 }
 0x1b7   :  { %v417_v28 = vmax.f32 %v373_v23, 0.0  ;;  %v365_v29 = vadd.f32 %v1164_v57, %v364_v49  ;;  %v427_v43 = vpack.c.bf16 %v412_v41, %v411_v42 }
 0x1b8   :  { %v1300_v50 = vpop.f32.mrf.mxu1 }
 0x1b9   :  { %v376_v20 = vadd.f32 %v1300_v50, %v1164_v57  ;;  %v415_v34 = vmax.f32 %v365_v29, 0.0 }
 0x1ba   :  { %v367_v51 = vpop.f32.mrf.mxu1 }
 0x1bb   :  { %v418_v25 = vmax.f32 %v376_v20, 0.0  ;;  %v368_v26 = vadd.f32 %v1164_v57, %v367_v51  ;;  %v1673_v20 = vld [vmem:[%s2065_s6] ss:$0 sm:$0xff] }
 0x1bc   :  { %v1303_v52 = vpop.f32.mrf.mxu1 }
 0x1bd   :  { %v389_v4 = vadd.f32 %v1303_v52, %v1164_v57  ;;  %v430_v31 = vpack.c.bf16 %v418_v25, %v417_v28  ;;  %v416_v32 = vmax.f32 %v368_v26, 0.0  ;;  %v1681_v25 = vld [vmem:[%s2066_s7] ss:$0 sm:$0xff] }
 0x1be   :  { %v380_v53 = vpop.f32.mrf.mxu1 }
 0x1bf   :  { %v421_v18 = vmax.f32 %v389_v4, 0.0  ;;  %v381_v19 = vadd.f32 %v1164_v57, %v380_v53  ;;  %v429_v37 = vpack.c.bf16 %v416_v32, %v415_v34 }
 0x1c0   :  { %v1304_v54 = vpop.f32.mrf.mxu1 }
 0x1c1   :  { %v392_v0 = vadd.f32 %v1304_v54, %v1164_v57  ;;  %v419_v24 = vmax.f32 %v381_v19, 0.0 }
 0x1c2   :  { %v383_v55 = vpop.f32.mrf.mxu1 }
 0x1c3   :  { %v422_v8 = vmax.f32 %v392_v0, 0.0  ;;  %v384_v16 = vadd.f32 %v1164_v57, %v383_v55 }
 0x1c4   :  { %v1307_v56 = vpop.f32.mrf.mxu1 }
 0x1c5   :  { %v405_v59 = vadd.f32 %v1307_v56, %v1164_v57  ;;  %v432_v21 = vpack.c.bf16 %v422_v8, %v421_v18  ;;  %v420_v22 = vmax.f32 %v384_v16, 0.0 }
 0x1c6   :  { %v396_v58 = vpop.f32.mrf.mxu1 }
 0x1c7   :  { %v397_v61 = vadd.f32 %v1164_v57, %v396_v58  ;;  %v425_v1 = vmax.f32 %v405_v59, 0.0  ;;  %v431_v27 = vpack.c.bf16 %v420_v22, %v419_v24 }
 0x1c8   :  { %v1308_v60 = vpop.f32.mrf.mxu1 }
 0x1c9   :  { %v408_v62 = vadd.f32 %v1308_v60, %v1164_v57  ;;  %v423_v5 = vmax.f32 %v397_v61, 0.0 }
 0x1ca   :  { %v399_v63 = vpop.f32.mrf.mxu1 }
 0x1cb   :  { %v426_v2 = vmax.f32 %v408_v62, 0.0  ;;  %v400_v3 = vadd.f32 %v1164_v57, %v399_v63  ;;  %v1401_v62 = vld [vmem:[%s2061_s10] sm:$0xff]  }
 0x1cc   :  { %v685_v63 = vld [vmem:[%s2062_s9] sm:$0x1] }
 0x1cd   :  { %v434_v6 = vpack.c.bf16 %v426_v2, %v425_v1  ;;  %v424_v7 = vmax.f32 %v400_v3, 0.0  ;;  %v686_v0 = vadd.f32 1e-05, %v685_v63  ;;  %v712_v1 = vlaneseq }
 0x1cf   :  { %v433_v17 = vpack.c.bf16 %v424_v7, %v423_v5  ;;  %1309 = vmatprep.subr.bf16.mxu1 %v434_v6  ;;  %1402 = vrsqrt.f32 %v686_v0  ;;  %v713_v2 = vshrl.u32 %v712_v1, 7  ;;  %v1658_v5 = vld [vmem:[%s2063_s5] ss:$0 sm:$0xff] }
 0x1d0   :  { %1310 = vmatpush3.bf16.msra.mxu1 %v434_v6  ;;  %v1663_v7 = vld [vmem:[%s2064_s8] ss:$0 sm:$0xff] }
 0x1d1   :  { %1311 = vmatprep.subr.bf16.mxu1 %v433_v17  ;;  %v714_v3 = vsub.s32 0, %v713_v2 }
 0x1d4   :  { %1312 = vmatpush3.bf16.msra.mxu1 %v433_v17 }
 0x1d5   :  { %1313 = vmatprep.subr.bf16.mxu1 %v432_v21 }
 0x1d8   :  { %1314 = vmatpush3.bf16.msra.mxu1 %v432_v21 }
 0x1d9   :  { %1315 = vmatprep.subr.bf16.mxu1 %v431_v27 }
 0x1dc   :  { %1316 = vmatpush3.bf16.msra.mxu1 %v431_v27  ;;  %v1403_v4 = vpop.eup %1402 }
 0x1dd   :  { %1317 = vmatprep.subr.bf16.mxu1 %v430_v31  ;;  %v1666_v16 = vrot.slane %v1403_v4, %v714_v3 }
 0x1e0   :  { %1318 = vmatpush3.bf16.msra.mxu1 %v430_v31 }
 0x1e1   :  { %1319 = vmatprep.subr.bf16.mxu1 %v429_v37 }
 0x1e4   :  { %1320 = vmatpush3.bf16.msra.mxu1 %v429_v37 }
 0x1e5   :  { %1321 = vmatprep.subr.bf16.mxu1 %v428_v40 }
 0x1e8   :  { %1322 = vmatpush3.bf16.msra.mxu1 %v428_v40 }
 0x1e9   :  { %1323 = vmatprep.subr.bf16.mxu1 %v427_v43 }
 0x1ec   :  { %1324 = vmatpush3.bf16.msra.mxu1 %v427_v43 }
 0x1ed   :  { %1361 = vmatprep.subr.bf16.mxu1 %v1400_v44 }
 0x1ef   :  { %1326 = vmatmul.mubr.bf16.vlgmr.msra.gmra.mxu1 %v1571_v9 }
 0x1f0   :  { %1329 = vmatprep.mubr.bf16.mxu1 %v1576_v10  ;;  %1362 = vmatpush3.bf16.msra.mxu1 %v1400_v44 }
 0x1f1   :  { %1363 = vmatprep.subr.bf16.mxu1 %v1401_v62 }
 0x1f4   :  { %1364 = vmatpush3.bf16.msra.mxu1 %v1401_v62 }
 0x1f7   :  { %1330 = vmatmul.mubr.bf16.gmra.mxu1 %v1583_v11 }
 0x1f8   :  { %1333 = vmatprep.mubr.bf16.mxu1 %v1588_v12 }
 0x1ff   :  { %1334 = vmatmul.mubr.bf16.gmra.mxu1 %v1595_v13 }
 0x200   :  { %1337 = vmatprep.mubr.bf16.mxu1 %v1600_v14 }
 0x207   :  { %1338 = vmatmul.mubr.bf16.gmra.mxu1 %v1607_v15 }
 0x2af   :  { %v1327_v45 = vpop.f32.mrf.mxu1 }
 0x2b1   :  { %v469_v9 = vpop.f32.mrf.mxu1 }
 0x2b3   :  { %v1328_v46 = vpop.f32.mrf.mxu1 }
 0x2b4   :  { %v533_v47 = vpack.c.bf16 %v1328_v46, %v1327_v45 }
 0x2b5   :  { %v472_v10 = vpop.f32.mrf.mxu1 }
 0x2b6   :  { %v532_v11 = vpack.c.bf16 %v472_v10, %v469_v9 }
 0x2b7   :  { %v1331_v12 = vpop.f32.mrf.mxu1 }
 0x2b8   :  { %1345 = vmatprep.mubr.msk.bf16.mxu0 %vm563_vm2, %v532_v11 }
 0x2b9   :  { %v485_v13 = vpop.f32.mrf.mxu1  ;;  %1346 = vmatmul.mubr.msk.bf16.vlgmr.msra.gmra.mxu0 %vm563_vm2, %v533_v47 }
 0x2bb   :  { %v1332_v14 = vpop.f32.mrf.mxu1 }
 0x2bc   :  { %v535_v49 = vpack.c.bf16 %v1332_v14, %v1331_v12 }
 0x2bd   :  { %v488_v15 = vpop.f32.mrf.mxu1 }
 0x2be   :  { %v534_v48 = vpack.c.bf16 %v488_v15, %v485_v13 }
 0x2bf   :  { %v1335_v50 = vpop.f32.mrf.mxu1 }
 0x2c0   :  { %1349 = vmatprep.mubr.msk.bf16.mxu0 %vm563_vm2, %v534_v48 }
 0x2c1   :  { %v501_v51 = vpop.f32.mrf.mxu1  ;;  %1350 = vmatmul.mubr.msk.bf16.gmra.mxu0 %vm563_vm2, %v535_v49 }
 0x2c3   :  { %v1336_v52 = vpop.f32.mrf.mxu1 }
 0x2c4   :  { %v537_v55 = vpack.c.bf16 %v1336_v52, %v1335_v50 }
 0x2c5   :  { %v504_v53 = vpop.f32.mrf.mxu1 }
 0x2c6   :  { %v536_v54 = vpack.c.bf16 %v504_v53, %v501_v51 }
 0x2c7   :  { %v1339_v56 = vpop.f32.mrf.mxu1 }
 0x2c8   :  { %1353 = vmatprep.mubr.msk.bf16.mxu0 %vm563_vm2, %v536_v54 }
 0x2c9   :  { %v517_v57 = vpop.f32.mrf.mxu1  ;;  %1354 = vmatmul.mubr.msk.bf16.gmra.mxu0 %vm563_vm2, %v537_v55 }
 0x2cb   :  { %v1340_v58 = vpop.f32.mrf.mxu1 }
 0x2cc   :  { %v539_v61 = vpack.c.bf16 %v1340_v58, %v1339_v56 }
 0x2cd   :  { %v520_v59 = vpop.f32.mrf.mxu1 }
 0x2ce   :  { %v538_v60 = vpack.c.bf16 %v520_v59, %v517_v57 }
 0x2d0   :  { %1357 = vmatprep.mubr.msk.bf16.mxu0 %vm563_vm2, %v538_v60 }
 0x2d1   :  { %1358 = vmatmul.mubr.msk.bf16.gmra.mxu0 %vm563_vm2, %v539_v61 }
 0x379   :  { %v1347_v6 = vpop.f32.mrf.mxu0 }
 0x37a   :  { %v631_v8 = vadd.f32 %v1347_v6, %v1658_v5 }
 0x37b   :  { %v622_v17 = vpop.f32.mrf.mxu0 }
 0x37c   :  { %v697_v18 = vsub.f32 %v631_v8, %v1663_v7  ;;  %v623_v19 = vadd.f32 %v1658_v5, %v622_v17 }
 0x37d   :  { %v1348_v21 = vpop.f32.mrf.mxu0 }
 0x37e   :  { %v719_v22 = vmul.f32 %v1666_v16, %v697_v18  ;;  %v695_v23 = vsub.f32 %v623_v19, %v1663_v7  ;;  %v634_v24 = vadd.f32 %v1348_v21, %v1658_v5 }
 0x37f   :  { %v625_v26 = vpop.f32.mrf.mxu0 }
 0x380   :  { %v742_v27 = vmul.f32 %v1673_v20, %v719_v22  ;;  %v717_v28 = vmul.f32 %v1666_v16, %v695_v23  ;;  %v698_v29 = vsub.f32 %v634_v24, %v1663_v7  ;;  %v626_v30 = vadd.f32 %v1658_v5, %v625_v26 }
 0x381   :  { %v1351_v31 = vpop.f32.mrf.mxu0 }
 0x382   :  { %v765_v32 = vadd.f32 %v1681_v25, %v742_v27  ;;  %v740_v33 = vmul.f32 %v1673_v20, %v717_v28  ;;  %v720_v34 = vmul.f32 %v1666_v16, %v698_v29  ;;  %v696_v35 = vsub.f32 %v626_v30, %v1663_v7 }
 0x383   :  { %v647_v36 = vadd.f32 %v1351_v31, %v1658_v5  ;;  %v638_v37 = vpop.f32.mrf.mxu0 }
 0x384   :  { %781 = vst.msk [vmem:[%s2067_s12 + $0x10] sm:$0xff] %vm563_vm2, %v765_v32  ;;  %v763_v38 = vadd.f32 %v1681_v25, %v740_v33  ;;  %v743_v39 = vmul.f32 %v1673_v20, %v720_v34  ;;  %v718_v40 = vmul.f32 %v1666_v16, %v696_v35  ;;  %v639_v41 = vadd.f32 %v1658_v5, %v638_v37 }
 0x385   :  { %v701_v42 = vsub.f32 %v647_v36, %v1663_v7  ;;  %v1352_v43 = vpop.f32.mrf.mxu0 }
 0x386   :  { %779 = vst.msk [vmem:[%s2067_s12] sm:$0xff] %vm563_vm2, %v763_v38  ;;  %v766_v44 = vadd.f32 %v1681_v25, %v743_v39  ;;  %v741_v45 = vmul.f32 %v1673_v20, %v718_v40  ;;  %v699_v9 = vsub.f32 %v639_v41, %v1663_v7  ;;  %v650_v46 = vadd.f32 %v1352_v43, %v1658_v5 }
 0x387   :  { %v723_v10 = vmul.f32 %v1666_v16, %v701_v42  ;;  %v641_v11 = vpop.f32.mrf.mxu0 }
 0x388   :  { %782 = vst.msk [vmem:[%s2067_s12 + $0x18] sm:$0xff] %vm563_vm2, %v766_v44  ;;  %v764_v47 = vadd.f32 %v1681_v25, %v741_v45  ;;  %v721_v12 = vmul.f32 %v1666_v16, %v699_v9  ;;  %v702_v13 = vsub.f32 %v650_v46, %v1663_v7  ;;  %v642_v15 = vadd.f32 %v1658_v5, %v641_v11 }
 0x389   :  { %v746_v14 = vmul.f32 %v1673_v20, %v723_v10  ;;  %v1355_v48 = vpop.f32.mrf.mxu0  ;;  %v796_v53 = vpack.c.bf16 %v766_v44, %v765_v32 }
 0x38a   :  { %780 = vst.msk [vmem:[%s2067_s12 + $0x8] sm:$0xff] %vm563_vm2, %v764_v47  ;;  %v744_v49 = vmul.f32 %v1673_v20, %v721_v12  ;;  %v724_v50 = vmul.f32 %v1666_v16, %v702_v13  ;;  %v663_v51 = vadd.f32 %v1355_v48, %v1658_v5  ;;  %v795_v52 = vpack.c.bf16 %v764_v47, %v763_v38 }
 0x38b   :  { %v769_v54 = vadd.f32 %v1681_v25, %v746_v14  ;;  %v700_v55 = vsub.f32 %v642_v15, %v1663_v7  ;;  %v654_v56 = vpop.f32.mrf.mxu0 }
 0x38c   :  { %v767_v57 = vadd.f32 %v1681_v25, %v744_v49  ;;  %v747_v58 = vmul.f32 %v1673_v20, %v724_v50  ;;  %v705_v59 = vsub.f32 %v663_v51, %v1663_v7  ;;  %v655_v60 = vadd.f32 %v1658_v5, %v654_v56  ;;  %1365 = vmatprep.mubr.msk.bf16.mxu1 %vm563_vm2, %v795_v52 }
 0x38d   :  { %785 = vst.msk [vmem:[%s2067_s12 + $0x30] sm:$0xff] %vm563_vm2, %v769_v54  ;;  %v722_v61 = vmul.f32 %v1666_v16, %v700_v55  ;;  %v1356_v62 = vpop.f32.mrf.mxu0  ;;  %1366 = vmatmul.mubr.msk.bf16.vlgmr.msra.gmra.mxu1 %vm563_vm2, %v796_v53 }
 0x38e   :  { %783 = vst.msk [vmem:[%s2067_s12 + $0x20] sm:$0xff] %vm563_vm2, %v767_v57  ;;  %v770_v63 = vadd.f32 %v1681_v25, %v747_v58  ;;  %v727_v0 = vmul.f32 %v1666_v16, %v705_v59  ;;  %v703_v1 = vsub.f32 %v655_v60, %v1663_v7  ;;  %v666_v2 = vadd.f32 %v1356_v62, %v1658_v5 }
 0x38f   :  { %v745_v3 = vmul.f32 %v1673_v20, %v722_v61  ;;  %v657_v4 = vpop.f32.mrf.mxu0 }
 0x390   :  { %786 = vst.msk [vmem:[%s2067_s12 + $0x38] sm:$0xff] %vm563_vm2, %v770_v63  ;;  %v750_v6 = vmul.f32 %v1673_v20, %v727_v0  ;;  %v725_v8 = vmul.f32 %v1666_v16, %v703_v1  ;;  %v706_v17 = vsub.f32 %v666_v2, %v1663_v7  ;;  %v658_v18 = vadd.f32 %v1658_v5, %v657_v4 }
 0x391   :  { %v768_v19 = vadd.f32 %v1681_v25, %v745_v3  ;;  %v1359_v21 = vpop.f32.mrf.mxu0  ;;  %v798_v30 = vpack.c.bf16 %v770_v63, %v769_v54 }
 0x392   :  { %v773_v22 = vadd.f32 %v1681_v25, %v750_v6  ;;  %v748_v23 = vmul.f32 %v1673_v20, %v725_v8  ;;  %v728_v24 = vmul.f32 %v1666_v16, %v706_v17  ;;  %v704_v26 = vsub.f32 %v658_v18, %v1663_v7 }
 0x393   :  { %784 = vst.msk [vmem:[%s2067_s12 + $0x28] sm:$0xff] %vm563_vm2, %v768_v19  ;;  %v679_v27 = vadd.f32 %v1359_v21, %v1658_v5  ;;  %v670_v28 = vpop.f32.mrf.mxu0  ;;  %v797_v29 = vpack.c.bf16 %v768_v19, %v767_v57 }
 0x394   :  { %789 = vst.msk [vmem:[%s2067_s12 + $0x50] sm:$0xff] %vm563_vm2, %v773_v22  ;;  %v771_v31 = vadd.f32 %v1681_v25, %v748_v23  ;;  %v751_v32 = vmul.f32 %v1673_v20, %v728_v24  ;;  %v726_v33 = vmul.f32 %v1666_v16, %v704_v26  ;;  %v671_v34 = vadd.f32 %v1658_v5, %v670_v28 }
 0x395   :  { %v709_v35 = vsub.f32 %v679_v27, %v1663_v7  ;;  %1369 = vmatprep.mubr.msk.bf16.mxu1 %vm563_vm2, %v797_v29  ;;  %v1360_v36 = vpop.f32.mrf.mxu0 }
 0x396   :  { %787 = vst.msk [vmem:[%s2067_s12 + $0x40] sm:$0xff] %vm563_vm2, %v771_v31  ;;  %v774_v37 = vadd.f32 %v1681_v25, %v751_v32  ;;  %v749_v38 = vmul.f32 %v1673_v20, %v726_v33  ;;  %v707_v39 = vsub.f32 %v671_v34, %v1663_v7  ;;  %v682_v40 = vadd.f32 %v1360_v36, %v1658_v5 }
 0x397   :  { %1370 = vmatmul.mubr.msk.bf16.gmra.mxu1 %vm563_vm2, %v798_v30  ;;  %v731_v41 = vmul.f32 %v1666_v16, %v709_v35  ;;  %v673_v42 = vpop.f32.mrf.mxu0 }
 0x398   :  { %790 = vst.msk [vmem:[%s2067_s12 + $0x58] sm:$0xff] %vm563_vm2, %v774_v37  ;;  %v772_v43 = vadd.f32 %v1681_v25, %v749_v38  ;;  %v729_v44 = vmul.f32 %v1666_v16, %v707_v39  ;;  %v710_v45 = vsub.f32 %v682_v40, %v1663_v7  ;;  %v674_v9 = vadd.f32 %v1658_v5, %v673_v42 }
 0x399   :  { %v754_v46 = vmul.f32 %v1673_v20, %v731_v41  ;;  %v800_v48 = vpack.c.bf16 %v774_v37, %v773_v22 }
 0x39a   :  { %788 = vst.msk [vmem:[%s2067_s12 + $0x48] sm:$0xff] %vm563_vm2, %v772_v43  ;;  %v752_v10 = vmul.f32 %v1673_v20, %v729_v44  ;;  %v732_v11 = vmul.f32 %v1666_v16, %v710_v45  ;;  %v708_v47 = vsub.f32 %v674_v9, %v1663_v7  ;;  %v799_v12 = vpack.c.bf16 %v772_v43, %v771_v31 }
 0x39b   :  { %v777_v13 = vadd.f32 %v1681_v25, %v754_v46 }
 0x39c   :  { %v775_v14 = vadd.f32 %v1681_v25, %v752_v10  ;;  %v755_v5 = vmul.f32 %v1673_v20, %v732_v11  ;;  %v730_v15 = vmul.f32 %v1666_v16, %v708_v47  ;;  %1373 = vmatprep.mubr.msk.bf16.mxu1 %vm563_vm2, %v799_v12 }
 0x39d   :  { %793 = vst.msk [vmem:[%s2067_s12 + $0x70] sm:$0xff] %vm563_vm2, %v777_v13 }
 0x39e   :  { %791 = vst.msk [vmem:[%s2067_s12 + $0x60] sm:$0xff] %vm563_vm2, %v775_v14  ;;  %v778_v7 = vadd.f32 %v1681_v25, %v755_v5  ;;  %v753_v49 = vmul.f32 %v1673_v20, %v730_v15  ;;  %v1187_v20 = vld [vmem:[%s2068_s11] ss:$0 sm:$0xff] }
 0x39f   :  { %1374 = vmatmul.mubr.msk.bf16.gmra.mxu1 %vm563_vm2, %v800_v48 }
 0x3a0   :  { %794 = vst.msk [vmem:[%s2067_s12 + $0x78] sm:$0xff] %vm563_vm2, %v778_v7  ;;  %v776_v16 = vadd.f32 %v1681_v25, %v753_v49  ;;  %v802_v51 = vpack.c.bf16 %v778_v7, %v777_v13 }
 0x3a2   :  { %792 = vst.msk [vmem:[%s2067_s12 + $0x68] sm:$0xff] %vm563_vm2, %v776_v16  ;;  %v801_v50 = vpack.c.bf16 %v776_v16, %v775_v14 }
 0x3a4   :  { %1377 = vmatprep.mubr.msk.bf16.mxu1 %vm563_vm2, %v801_v50 }
 0x3a7   :  { %1378 = vmatmul.mubr.msk.bf16.gmra.mxu1 %vm563_vm2, %v802_v51 }
 0x44d   :  { %v1367_v52 = vpop.f32.mrf.mxu1 }
 0x44e   :  { %v1832_v53 = vadd.f32 %v1367_v52, %v1187_v20 }
 0x44f   :  { %v884_v25 = vpop.f32.mrf.mxu1 }
 0x450   :  { %v1834_v54 = vadd.f32 %v1187_v20, %v884_v25  ;;  %v954_v55 = vsel %vm947_vm3, %v1832_v53, -inf }
 0x451   :  { %955 = vmax.xlane.f32.xlu1 %v954_v55  ;;  %v1368_v56 = vpop.f32.mrf.mxu1 }
 0x452   :  { %v1838_v57 = vadd.f32 %v1368_v56, %v1187_v20  ;;  %v948_v58 = vsel %vm947_vm3, %v1834_v54, -inf }
 0x453   :  { %v887_v59 = vpop.f32.mrf.mxu1  ;;  %949 = vmax.xlane.f32.xlu0 %v948_v58 }
 0x454   :  { %v1842_v60 = vadd.f32 %v1187_v20, %v887_v59  ;;  %v957_v61 = vsel %vm947_vm3, %v1838_v57, -inf }
 0x455   :  { %958 = vmax.xlane.f32.xlu1 %v957_v61 }
 0x456   :  { %v951_v63 = vsel %vm947_vm3, %v1842_v60, -inf }
 0x457   :  { %v1371_v62 = vpop.f32.mrf.mxu1  ;;  %952 = vmax.xlane.f32.xlu0 %v951_v63 }
 0x458   :  { %v1848_v0 = vadd.f32 %v1371_v62, %v1187_v20 }
 0x459   :  { %v900_v1 = vpop.f32.mrf.mxu1 }
 0x45a   :  { %v1850_v2 = vadd.f32 %v1187_v20, %v900_v1  ;;  %v966_v4 = vsel %vm947_vm3, %v1848_v0, -inf }
 0x45b   :  { %v1372_v3 = vpop.f32.mrf.mxu1  ;;  %967 = vmax.xlane.f32.xlu0 %v966_v4 }
 0x45c   :  { %v1854_v6 = vadd.f32 %v1372_v3, %v1187_v20  ;;  %v960_v21 = vsel %vm947_vm3, %v1850_v2, -inf }
 0x45d   :  { %v903_v8 = vpop.f32.mrf.mxu1 }
 0x45e   :  { %v1856_v17 = vadd.f32 %v1187_v20, %v903_v8  ;;  %v969_v18 = vsel %vm947_vm3, %v1854_v6, -inf }
 0x45f   :  { %970 = vmax.xlane.f32.xlu1 %v969_v18  ;;  %v1375_v19 = vpop.f32.mrf.mxu1  ;;  %961 = vmax.xlane.f32.xlu0 %v960_v21 }
 0x460   :  { %v1862_v22 = vadd.f32 %v1375_v19, %v1187_v20  ;;  %v963_v24 = vsel %vm947_vm3, %v1856_v17, -inf }
 0x461   :  { %v916_v23 = vpop.f32.mrf.mxu1 }
 0x462   :  { %v1866_v26 = vadd.f32 %v1187_v20, %v916_v23  ;;  %v978_v28 = vsel %vm947_vm3, %v1862_v22, -inf }
 0x463   :  { %v1376_v27 = vpop.f32.mrf.mxu1  ;;  %964 = vmax.xlane.f32.xlu1 %v963_v24  ;;  %979 = vmax.xlane.f32.xlu0 %v978_v28 }
 0x464   :  { %v1870_v29 = vadd.f32 %v1376_v27, %v1187_v20  ;;  %v972_v34 = vsel %vm947_vm3, %v1866_v26, -inf }
 0x465   :  { %v919_v30 = vpop.f32.mrf.mxu1 }
 0x466   :  { %v1872_v31 = vadd.f32 %v1187_v20, %v919_v30  ;;  %v981_v32 = vsel %vm947_vm3, %v1870_v29, -inf }
 0x467   :  { %982 = vmax.xlane.f32.xlu1 %v981_v32  ;;  %v1379_v33 = vpop.f32.mrf.mxu1  ;;  %973 = vmax.xlane.f32.xlu0 %v972_v34 }
 0x468   :  { %v975_v37 = vsel %vm947_vm3, %v1872_v31, -inf  ;;  %v1882_v39 = vadd.f32 %v1379_v33, %v1187_v20 }
 0x469   :  { %v932_v35 = vpop.f32.mrf.mxu1 }
 0x46a   :  { %v1878_v36 = vadd.f32 %v1187_v20, %v932_v35  ;;  %v990_v45 = vsel %vm947_vm3, %v1882_v39, -inf }
 0x46b   :  { %976 = vmax.xlane.f32.xlu1 %v975_v37  ;;  %v1380_v38 = vpop.f32.mrf.mxu1 }
 0x46c   :  { %v984_v40 = vsel %vm947_vm3, %v1878_v36, -inf  ;;  %v1888_v43 = vadd.f32 %v1380_v38, %v1187_v20 }
 0x46d   :  { %v935_v41 = vpop.f32.mrf.mxu1  ;;  %985 = vmax.xlane.f32.xlu0 %v984_v40 }
 0x46e   :  { %v1886_v42 = vadd.f32 %v1187_v20, %v935_v41  ;;  %v993_v9 = vsel %vm947_vm3, %v1888_v43, -inf }
 0x470   :  { %v987_v44 = vsel %vm947_vm3, %v1886_v42, -inf }
 0x471   :  { %988 = vmax.xlane.f32.xlu1 %v987_v44  ;;  %991 = vmax.xlane.f32.xlu0 %v990_v45 }
 0x475   :  { %994 = vmax.xlane.f32.xlu1 %v993_v9 }
 0x4da   :  { %v956_v46 = vpop.xlane.xlu1 %955 }
 0x4db   :  { %v998_v10 = vsub.f32 %v1832_v53, %v956_v46 }
 0x4dc   :  { %v950_v11 = vpop.xlane.xlu0 %949 }
 0x4dd   :  { %v1016_v47 = vmul.f32 1.442695, %v998_v10  ;;  %v996_v12 = vsub.f32 %v1834_v54, %v950_v11 }
 0x4de   :  { %v959_v13 = vpop.xlane.xlu1 %958 }
 0x4df   :  { %1404 = vpow2.f32 %v1016_v47  ;;  %v1012_v14 = vmul.f32 1.442695, %v996_v12  ;;  %v999_v5 = vsub.f32 %v1838_v57, %v959_v13 }
 0x4e0   :  { %v953_v15 = vpop.xlane.xlu0 %952 }
 0x4e1   :  { %1406 = vpow2.f32 %v1012_v14  ;;  %v1018_v48 = vmul.f32 1.442695, %v999_v5  ;;  %v997_v7 = vsub.f32 %v1842_v60, %v953_v15 }
 0x4e3   :  { %1408 = vpow2.f32 %v1018_v48  ;;  %v1014_v49 = vmul.f32 1.442695, %v997_v7 }
 0x4e4   :  { %v968_v16 = vpop.xlane.xlu0 %967 }
 0x4e5   :  { %1410 = vpow2.f32 %v1014_v49  ;;  %v1002_v50 = vsub.f32 %v1848_v0, %v968_v16 }
 0x4e7   :  { %v1024_v51 = vmul.f32 1.442695, %v1002_v50 }
 0x4e8   :  { %v971_v20 = vpop.xlane.xlu1 %970  ;;  %v962_v53 = vpop.xlane.xlu0 %961 }
 0x4e9   :  { %v1003_v52 = vsub.f32 %v1854_v6, %v971_v20  ;;  %1412 = vpow2.f32 %v1024_v51  ;;  %v1000_v25 = vsub.f32 %v1850_v2, %v962_v53 }
 0x4eb   :  { %v1026_v54 = vmul.f32 1.442695, %v1003_v52  ;;  %v1020_v55 = vmul.f32 1.442695, %v1000_v25 }
 0x4ec   :  { %v965_v56 = vpop.xlane.xlu1 %964  ;;  %v1903_v57 = vpop.eup %1404 }
 0x4ed   :  { %1414 = vpow2.f32 %v1026_v54  ;;  %v1001_v58 = vsub.f32 %v1856_v17, %v965_v56  ;;  %v980_v59 = vpop.xlane.xlu0 %979  ;;  %v1050_v61 = vsel %vm947_vm3, %v1903_v57, 0.0 }
 0x4ee   :  { %1416 = vpow2.f32 %v1020_v55  ;;  %v1006_v60 = vsub.f32 %v1862_v22, %v980_v59  ;;  %v1909_v62 = vpop.eup %1406  ;;  %1051 = vadd.xlane.f32.xlu0 %v1050_v61 }
 0x4ef   :  { %v1022_v63 = vmul.f32 1.442695, %v1001_v58  ;;  %v1044_v17 = vsel %vm947_vm3, %v1909_v62, 0.0 }
 0x4f0   :  { %v1032_v0 = vmul.f32 1.442695, %v1006_v60  ;;  %v983_v1 = vpop.xlane.xlu1 %982  ;;  %v1911_v2 = vpop.eup %1408 }
 0x4f1   :  { %1418 = vpow2.f32 %v1022_v63  ;;  %v1007_v3 = vsub.f32 %v1870_v29, %v983_v1  ;;  %v974_v4 = vpop.xlane.xlu0 %973  ;;  %v1053_v8 = vsel %vm947_vm3, %v1911_v2, 0.0 }
 0x4f2   :  { %1420 = vpow2.f32 %v1032_v0  ;;  %v1004_v6 = vsub.f32 %v1866_v26, %v974_v4  ;;  %v1919_v18 = vpop.eup %1410  ;;  %1054 = vadd.xlane.f32.xlu1 %v1053_v8  ;;  %1045 = vadd.xlane.f32.xlu0 %v1044_v17 }
 0x4f3   :  { %v1034_v19 = vmul.f32 1.442695, %v1007_v3  ;;  %v1047_v26 = vsel %vm947_vm3, %v1919_v18, 0.0 }
 0x4f4   :  { %v1028_v21 = vmul.f32 1.442695, %v1004_v6  ;;  %v977_v22 = vpop.xlane.xlu1 %976 }
 0x4f5   :  { %1422 = vpow2.f32 %v1034_v19  ;;  %v1005_v23 = vsub.f32 %v1872_v31, %v977_v22 }
 0x4f6   :  { %1424 = vpow2.f32 %v1028_v21  ;;  %v986_v24 = vpop.xlane.xlu0 %985  ;;  %v1924_v27 = vpop.eup %1412  ;;  %1048 = vadd.xlane.f32.xlu1 %v1047_v26 }
 0x4f7   :  { %v1030_v28 = vmul.f32 1.442695, %v1005_v23  ;;  %v1008_v29 = vsub.f32 %v1878_v36, %v986_v24  ;;  %v1062_v30 = vsel %vm947_vm3, %v1924_v27, 0.0 }
 0x4f8   :  { %1063 = vadd.xlane.f32.xlu0 %v1062_v30 }
 0x4f9   :  { %1426 = vpow2.f32 %v1030_v28  ;;  %v1036_v32 = vmul.f32 1.442695, %v1008_v29 }
 0x4fa   :  { %v1929_v33 = vpop.eup %1414  ;;  %v989_v31 = vpop.xlane.xlu1 %988 }
 0x4fb   :  { %v992_v34 = vpop.xlane.xlu0 %991  ;;  %v1931_v35 = vpop.eup %1416  ;;  %1428 = vpow2.f32 %v1036_v32  ;;  %v1009_v37 = vsub.f32 %v1886_v42, %v989_v31  ;;  %v1065_v36 = vsel %vm947_vm3, %v1929_v33, 0.0 }
 0x4fc   :  { %v1010_v38 = vsub.f32 %v1882_v39, %v992_v34  ;;  %1066 = vadd.xlane.f32.xlu1 %v1065_v36  ;;  %v1056_v40 = vsel %vm947_vm3, %v1931_v35, 0.0 }
 0x4fd   :  { %v1038_v41 = vmul.f32 1.442695, %v1009_v37  ;;  %1057 = vadd.xlane.f32.xlu0 %v1056_v40 }
 0x4fe   :  { %v1040_v44 = vmul.f32 1.442695, %v1010_v38  ;;  %v1939_v45 = vpop.eup %1418  ;;  %v995_v9 = vpop.xlane.xlu1 %994 }
 0x4ff   :  { %v1941_v46 = vpop.eup %1420  ;;  %1430 = vpow2.f32 %v1038_v41  ;;  %v1011_v42 = vsub.f32 %v1888_v43, %v995_v9  ;;  %v1059_v39 = vsel %vm947_vm3, %v1939_v45, 0.0 }
 0x500   :  { %1432 = vpow2.f32 %v1040_v44  ;;  %1060 = vadd.xlane.f32.xlu1 %v1059_v39  ;;  %v1074_v10 = vsel %vm947_vm3, %v1941_v46, 0.0 }
 0x501   :  { %v1042_v11 = vmul.f32 1.442695, %v1011_v42  ;;  %1075 = vadd.xlane.f32.xlu0 %v1074_v10 }
 0x502   :  { %v1948_v47 = vpop.eup %1422 }
 0x503   :  { %v1950_v12 = vpop.eup %1424  ;;  %1434 = vpow2.f32 %v1042_v11  ;;  %v1077_v13 = vsel %vm947_vm3, %v1948_v47, 0.0 }
 0x504   :  { %1078 = vadd.xlane.f32.xlu1 %v1077_v13  ;;  %v1068_v43 = vsel %vm947_vm3, %v1950_v12, 0.0 }
 0x505   :  { %1069 = vadd.xlane.f32.xlu0 %v1068_v43 }
 0x506   :  { %v1956_v14 = vpop.eup %1426 }
 0x507   :  { %v1071_v5 = vsel %vm947_vm3, %v1956_v14, 0.0 }
 0x508   :  { %v1960_v15 = vpop.eup %1428  ;;  %1072 = vadd.xlane.f32.xlu1 %v1071_v5 }
 0x509   :  { %v1080_v48 = vsel %vm947_vm3, %v1960_v15, 0.0 }
 0x50a   :  { %1081 = vadd.xlane.f32.xlu0 %v1080_v48 }
 0x50c   :  { %v1964_v7 = vpop.eup %1430 }
 0x50d   :  { %v1966_v49 = vpop.eup %1432  ;;  %v1083_v16 = vsel %vm947_vm3, %v1964_v7, 0.0 }
 0x50e   :  { %1084 = vadd.xlane.f32.xlu1 %v1083_v16  ;;  %v1086_v50 = vsel %vm947_vm3, %v1966_v49, 0.0 }
 0x50f   :  { %1087 = vadd.xlane.f32.xlu0 %v1086_v50 }
 0x510   :  { %v1972_v51 = vpop.eup %1434 }
 0x511   :  { %v1089_v20 = vsel %vm947_vm3, %v1972_v51, 0.0 }
 0x512   :  { %1090 = vadd.xlane.f32.xlu1 %v1089_v20 }
 0x577   :  { %v1052_v52 = vpop.xlane.xlu0 %1051 }
 0x578   :  { %1436 = vrcp.f32 %v1052_v52 }
 0x57b   :  { %v1055_v53 = vpop.xlane.xlu1 %1054  ;;  %v1046_v25 = vpop.xlane.xlu0 %1045 }
 0x57c   :  { %1438 = vrcp.f32 %v1055_v53 }
 0x57d   :  { %1440 = vrcp.f32 %v1046_v25 }
 0x57f   :  { %v1049_v54 = vpop.xlane.xlu1 %1048 }
 0x580   :  { %1442 = vrcp.f32 %v1049_v54 }
 0x581   :  { %v1064_v55 = vpop.xlane.xlu0 %1063 }
 0x582   :  { %1444 = vrcp.f32 %v1064_v55 }
 0x585   :  { %v1067_v56 = vpop.xlane.xlu1 %1066  ;;  %v1437_v58 = vpop.eup %1436 }
 0x586   :  { %1446 = vrcp.f32 %v1067_v56  ;;  %v1058_v59 = vpop.xlane.xlu0 %1057  ;;  %v1110_v60 = vmul.f32 %v1437_v58, %v1903_v57 }
 0x587   :  { %1448 = vrcp.f32 %v1058_v59 }
 0x588   :  { %1126 = vst.msk [vmem:[%s2069_s13 + $0x10] sm:$0xff] %vm947_vm3, %v1110_v60 }
 0x589   :  { %v1061_v61 = vpop.xlane.xlu1 %1060  ;;  %v1439_v63 = vpop.eup %1438 }
 0x58a   :  { %1450 = vrcp.f32 %v1061_v61  ;;  %v1076_v0 = vpop.xlane.xlu0 %1075  ;;  %v1441_v1 = vpop.eup %1440  ;;  %v1111_v3 = vmul.f32 %v1439_v63, %v1911_v2 }
 0x58b   :  { %1452 = vrcp.f32 %v1076_v0  ;;  %v1108_v4 = vmul.f32 %v1441_v1, %v1909_v62 }
 0x58c   :  { %1127 = vst.msk [vmem:[%s2069_s13 + $0x18] sm:$0xff] %vm947_vm3, %v1111_v3 }
 0x58d   :  { %v1079_v57 = vpop.xlane.xlu1 %1078  ;;  %v1443_v6 = vpop.eup %1442  ;;  %1124 = vst.msk [vmem:[%s2069_s13] sm:$0xff] %vm947_vm3, %v1108_v4 }
 0x58e   :  { %1454 = vrcp.f32 %v1079_v57  ;;  %v1070_v8 = vpop.xlane.xlu0 %1069  ;;  %v1109_v17 = vmul.f32 %v1443_v6, %v1919_v18 }
 0x58f   :  { %1456 = vrcp.f32 %v1070_v8  ;;  %v1445_v2 = vpop.eup %1444 }
 0x590   :  { %1125 = vst.msk [vmem:[%s2069_s13 + $0x8] sm:$0xff] %vm947_vm3, %v1109_v17  ;;  %v1114_v62 = vmul.f32 %v1445_v2, %v1924_v27 }
 0x591   :  { %v1073_v19 = vpop.xlane.xlu1 %1072 }
 0x592   :  { %1458 = vrcp.f32 %v1073_v19  ;;  %1130 = vst.msk [vmem:[%s2069_s13 + $0x30] sm:$0xff] %vm947_vm3, %v1114_v62 }
 0x593   :  { %v1447_v21 = vpop.eup %1446  ;;  %v1082_v22 = vpop.xlane.xlu0 %1081 }
 0x594   :  { %v1449_v23 = vpop.eup %1448  ;;  %v1115_v18 = vmul.f32 %v1447_v21, %v1929_v33  ;;  %1460 = vrcp.f32 %v1082_v22 }
 0x595   :  { %v1112_v24 = vmul.f32 %v1449_v23, %v1931_v35 }
 0x596   :  { %1131 = vst.msk [vmem:[%s2069_s13 + $0x38] sm:$0xff] %vm947_vm3, %v1115_v18 }
 0x597   :  { %v1451_v26 = vpop.eup %1450  ;;  %1128 = vst.msk [vmem:[%s2069_s13 + $0x20] sm:$0xff] %vm947_vm3, %v1112_v24  ;;  %v1085_v27 = vpop.xlane.xlu1 %1084 }
 0x598   :  { %v1453_v28 = vpop.eup %1452  ;;  %v1113_v29 = vmul.f32 %v1451_v26, %v1939_v45  ;;  %1462 = vrcp.f32 %v1085_v27  ;;  %v1088_v30 = vpop.xlane.xlu0 %1087 }
 0x599   :  { %v1118_v32 = vmul.f32 %v1453_v28, %v1941_v46  ;;  %1464 = vrcp.f32 %v1088_v30 }
 0x59a   :  { %1129 = vst.msk [vmem:[%s2069_s13 + $0x28] sm:$0xff] %vm947_vm3, %v1113_v29 }
 0x59b   :  { %v1455_v33 = vpop.eup %1454  ;;  %1134 = vst.msk [vmem:[%s2069_s13 + $0x50] sm:$0xff] %vm947_vm3, %v1118_v32  ;;  %v1091_v31 = vpop.xlane.xlu1 %1090 }
 0x59c   :  { %v1457_v34 = vpop.eup %1456  ;;  %v1119_v35 = vmul.f32 %v1455_v33, %v1948_v47  ;;  %1466 = vrcp.f32 %v1091_v31 }
 0x59d   :  { %v1116_v37 = vmul.f32 %v1457_v34, %v1950_v12 }
 0x59e   :  { %1135 = vst.msk [vmem:[%s2069_s13 + $0x58] sm:$0xff] %vm947_vm3, %v1119_v35 }
 0x59f   :  { %v1459_v38 = vpop.eup %1458  ;;  %1132 = vst.msk [vmem:[%s2069_s13 + $0x40] sm:$0xff] %vm947_vm3, %v1116_v37 }
 0x5a0   :  { %v1117_v36 = vmul.f32 %v1459_v38, %v1956_v14 }
 0x5a1   :  { %v1461_v40 = vpop.eup %1460 }
 0x5a2   :  { %1133 = vst.msk [vmem:[%s2069_s13 + $0x48] sm:$0xff] %vm947_vm3, %v1117_v36  ;;  %v1120_v41 = vmul.f32 %v1461_v40, %v1960_v15 }
 0x5a4   :  { %1136 = vst.msk [vmem:[%s2069_s13 + $0x60] sm:$0xff] %vm947_vm3, %v1120_v41 }
 0x5a5   :  { %v1463_v44 = vpop.eup %1462 }
 0x5a6   :  { %v1465_v45 = vpop.eup %1464  ;;  %v1121_v9 = vmul.f32 %v1463_v44, %v1964_v7 }
 0x5a7   :  { %v1122_v46 = vmul.f32 %v1465_v45, %v1966_v49 }
 0x5a8   :  { %1137 = vst.msk [vmem:[%s2069_s13 + $0x68] sm:$0xff] %vm947_vm3, %v1121_v9 }
 0x5a9   :  { %v1467_v42 = vpop.eup %1466  ;;  %1138 = vst.msk [vmem:[%s2069_s13 + $0x70] sm:$0xff] %vm947_vm3, %v1122_v46 }
 0x5aa   :  { %v1123_v39 = vmul.f32 %v1467_v42, %v1972_v51 }
 0x5ac   :  { %1139 = vst.msk [vmem:[%s2069_s13 + $0x78] sm:$0xff] %vm947_vm3, %v1123_v39 }

</bundles_post_ra>
